<compile_context>
chip_gen: v7x
topology: tpu7x:2x2x1
jax: 0.10.0
libtpu: 0.0.40
codegen_flags: <defaults>
</compile_context>

<pallas_src>
import jax
import jax.numpy as jnp
from jax.experimental import pallas as pl
from jax.experimental.pallas import tpu as pltpu


IN1, H1, H2, OUT = 2, 5, 5, 2          # layer widths of the PyTorch module
LANE = 128                              # vreg lane width
MAX_ROWS_PER_TILE = 512                 # 512 sublane-rows * 128 lanes = 64K batch / tile

# Flat offsets into the packed parameter vector (PyTorch (out,in) row-major).
_OFF_W1 = 0
_OFF_B1 = _OFF_W1 + H1 * IN1            # 10
_OFF_W2 = _OFF_B1 + H1                  # 15
_OFF_B2 = _OFF_W2 + H2 * H1             # 40
_OFF_W3 = _OFF_B2 + H2                  # 45
_OFF_B3 = _OFF_W3 + OUT * H2            # 55
PACKED_LEN = _OFF_B3 + OUT              # 57


def _cdiv(a, b):
    return -(-a // b)


def _round_up(a, b):
    return _cdiv(a, b) * b


def mlp_kernel(p_ref, x_ref, o_ref):
    """p_ref: (PACKED_LEN,) f32 in SMEM (scalar weights/biases).
    x_ref: (IN1, tbs, 128) input planes.  o_ref: (OUT, tbs, 128) output planes."""
    x = [x_ref[k] for k in range(IN1)]            # IN1 full (tbs,128) planes

    def dense_tanh(planes, w_off, b_off, fan_in, fan_out):
        outs = []
        for j in range(fan_out):
            # scalar (SMEM) x plane (VPU) multiply-adds; scalars broadcast free
            acc = planes[0] * p_ref[w_off + j * fan_in]
            for k in range(1, fan_in):
                acc = acc + planes[k] * p_ref[w_off + j * fan_in + k]
            outs.append(jnp.tanh(acc + p_ref[b_off + j]))   # tanh -> EUP slot
        return outs

    h = dense_tanh(x, _OFF_W1, _OFF_B1, IN1, H1)
    h = dense_tanh(h, _OFF_W2, _OFF_B2, H1, H2)
    h = dense_tanh(h, _OFF_W3, _OFF_B3, H2, OUT)
    for j in range(OUT):
        o_ref[j] = h[j].astype(o_ref.dtype)


def pack_params(params):
    """Flatten PyTorch-layout weights (out,in) and biases (out,) into (57,) f32.
    Call ONCE at init; pass the result to the forward functions."""
    parts = [params["w1"], params["b1"],
             params["w2"], params["b2"],
             params["w3"], params["b3"]]
    return jnp.concatenate([p.astype(jnp.float32).reshape(-1) for p in parts])


def _choose_rows_tile(rows):
    """Pick the sublane-row tile: big tiles for DMA efficiency, but >=2 tiles
    (when the batch allows) so the parallel grid axis can use both v7x TCs."""
    if rows < 16:
        return rows                                   # single full-extent tile
    n_tiles = max(2, _cdiv(rows, MAX_ROWS_PER_TILE))
    return _round_up(_cdiv(rows, n_tiles), 8)         # (8,128) tiling constraint


def network_forward_fm(x_fm, packed):
    """Feature-major core: x_fm (2, B) f32 -> (2, B) f32. No transpose passes."""
    B = x_fm.shape[1]
    rows = _cdiv(max(B, 1), LANE)
    tbs = _choose_rows_tile(rows)
    n_rows = _round_up(rows, tbs)
    Bp = n_rows * LANE
    if Bp != B:
        x_fm = jnp.pad(x_fm, ((0, 0), (0, Bp - B)))
    x3 = x_fm.reshape(IN1, n_rows, LANE)              # contiguous -> free reshape

    out3 = pl.pallas_call(
        mlp_kernel,
        out_shape=jax.ShapeDtypeStruct((OUT, n_rows, LANE), jnp.float32),
        grid_spec=pltpu.PrefetchScalarGridSpec(
            num_scalar_prefetch=0,
            grid=(n_rows // tbs,),
            in_specs=[
                # tiny parameter table: whole array in SMEM, read as scalars
                pl.BlockSpec(memory_space=pltpu.MemorySpace.SMEM),
                # activations: batch tiled on sublanes+lanes, lane-dense planes
                pl.BlockSpec((IN1, tbs, LANE), lambda i: (0, i, 0)),
            ],
            out_specs=pl.BlockSpec((OUT, tbs, LANE), lambda i: (0, i, 0)),
        ),
        compiler_params=pltpu.CompilerParams(
            dimension_semantics=("parallel",),        # shard batch tiles across TCs
            vmem_limit_bytes=32 * 1024 * 1024,        # headroom over v5e's 16 MiB default
        ),
    )(packed, x3)

    return out3.reshape(OUT, Bp)[:, :B]


def network_forward(x, packed):
    """Drop-in (B, 2) -> (B, 2) wrapper matching the PyTorch module interface.
    Callers that can keep data feature-major should call network_forward_fm
    directly and skip these two transposes (extra HBM passes for large B)."""
    return network_forward_fm(x.T, packed).T


def init_params(key):
    """Deterministic init mimicking nn.Linear's U(-1/sqrt(fan_in), 1/sqrt(fan_in))."""
    def linear(key, fan_in, fan_out):
        kw, kb = jax.random.split(key)
        bound = 1.0 / jnp.sqrt(fan_in)
        w = jax.random.uniform(kw, (fan_out, fan_in), jnp.float32, -bound, bound)
        b = jax.random.uniform(kb, (fan_out,), jnp.float32, -bound, bound)
        return w, b

    k1, k2, k3 = jax.random.split(key, 3)
    w1, b1 = linear(k1, IN1, H1)
    w2, b2 = linear(k2, H1, H2)
    w3, b3 = linear(k3, H2, OUT)
    return {"w1": w1, "b1": b1, "w2": w2, "b2": b2, "w3": w3, "b3": b3}


def reference_forward(x, params):
    h = jnp.tanh(x @ params["w1"].T + params["b1"])
    h = jnp.tanh(h @ params["w2"].T + params["b2"])
    h = jnp.tanh(h @ params["w3"].T + params["b3"])
    return h


if __name__ == "__main__":
    key = jax.random.PRNGKey(0)
    kx, kp = jax.random.split(key)

    B = 8
    x = jax.random.normal(kx, (B, 2), jnp.float32)
    params = init_params(kp)
    packed = pack_params(params)          # built once, outside the forward

    fwd = jax.jit(network_forward)        # jitted end-to-end
    out = jax.block_until_ready(fwd(x, packed))

    ref = reference_forward(x, params)
    assert out.shape == (B, 2)
    assert jnp.allclose(out, ref, atol=1e-5, rtol=1e-5)

    print("KERNEL_OK")
</pallas_src>

<mosaic_0001>
module attributes {stable_mosaic.version = 11 : i64} {
  func.func @mlp_kernel(%arg0: i32, %arg1: memref<57xf32, #tpu.memory_space<smem>>, %arg2: memref<2x1x128xf32, #tpu.memory_space<vmem>>, %arg3: memref<2x1x128xf32, #tpu.memory_space<vmem>>) attributes {dimension_semantics = [#tpu.dimension_semantics<parallel>], iteration_bounds = array<i64: 1>, scalar_prefetch = 0 : i64, scratch_operands = 0 : i64, tpu.core_type = #tpu.core_type<tc>, window_params = [{transform_indices = @transform_0, window_bounds = array<i64: 57>}, {transform_indices = @transform_1, window_bounds = array<i64: 2, 1, 128>}, {transform_indices = @transform_2, window_bounds = array<i64: 2, 1, 128>}]} {
    %c0 = arith.constant 0 : index
    %c0_0 = arith.constant 0 : index
    %c0_1 = arith.constant 0 : index
    %0 = vector.load %arg2[%c0, %c0_0, %c0_1] : memref<2x1x128xf32, #tpu.memory_space<vmem>>, vector<1x1x128xf32>
    %1 = vector.shape_cast %0 : vector<1x1x128xf32> to vector<1x128xf32>
    %c1 = arith.constant 1 : index
    %c0_2 = arith.constant 0 : index
    %c0_3 = arith.constant 0 : index
    %2 = vector.load %arg2[%c1, %c0_2, %c0_3] : memref<2x1x128xf32, #tpu.memory_space<vmem>>, vector<1x1x128xf32>
    %3 = vector.shape_cast %2 : vector<1x1x128xf32> to vector<1x128xf32>
    %c0_4 = arith.constant 0 : index
    %4 = memref.load %arg1[%c0_4] : memref<57xf32, #tpu.memory_space<smem>>
    %5 = vector.broadcast %4 : f32 to vector<1x128xf32>
    %6 = arith.mulf %1, %5 : vector<1x128xf32>
    %c1_5 = arith.constant 1 : index
    %7 = memref.load %arg1[%c1_5] : memref<57xf32, #tpu.memory_space<smem>>
    %8 = vector.broadcast %7 : f32 to vector<1x128xf32>
    %9 = arith.mulf %3, %8 : vector<1x128xf32>
    %10 = arith.addf %6, %9 : vector<1x128xf32>
    %c10 = arith.constant 10 : index
    %11 = memref.load %arg1[%c10] : memref<57xf32, #tpu.memory_space<smem>>
    %12 = vector.broadcast %11 : f32 to vector<1x128xf32>
    %13 = arith.addf %10, %12 : vector<1x128xf32>
    %14 = math.tanh %13 : vector<1x128xf32>
    %c2 = arith.constant 2 : index
    %15 = memref.load %arg1[%c2] : memref<57xf32, #tpu.memory_space<smem>>
    %16 = vector.broadcast %15 : f32 to vector<1x128xf32>
    %17 = arith.mulf %1, %16 : vector<1x128xf32>
    %c3 = arith.constant 3 : index
    %18 = memref.load %arg1[%c3] : memref<57xf32, #tpu.memory_space<smem>>
    %19 = vector.broadcast %18 : f32 to vector<1x128xf32>
    %20 = arith.mulf %3, %19 : vector<1x128xf32>
    %21 = arith.addf %17, %20 : vector<1x128xf32>
    %c11 = arith.constant 11 : index
    %22 = memref.load %arg1[%c11] : memref<57xf32, #tpu.memory_space<smem>>
    %23 = vector.broadcast %22 : f32 to vector<1x128xf32>
    %24 = arith.addf %21, %23 : vector<1x128xf32>
    %25 = math.tanh %24 : vector<1x128xf32>
    %c4 = arith.constant 4 : index
    %26 = memref.load %arg1[%c4] : memref<57xf32, #tpu.memory_space<smem>>
    %27 = vector.broadcast %26 : f32 to vector<1x128xf32>
    %28 = arith.mulf %1, %27 : vector<1x128xf32>
    %c5 = arith.constant 5 : index
    %29 = memref.load %arg1[%c5] : memref<57xf32, #tpu.memory_space<smem>>
    %30 = vector.broadcast %29 : f32 to vector<1x128xf32>
    %31 = arith.mulf %3, %30 : vector<1x128xf32>
    %32 = arith.addf %28, %31 : vector<1x128xf32>
    %c12 = arith.constant 12 : index
    %33 = memref.load %arg1[%c12] : memref<57xf32, #tpu.memory_space<smem>>
    %34 = vector.broadcast %33 : f32 to vector<1x128xf32>
    %35 = arith.addf %32, %34 : vector<1x128xf32>
    %36 = math.tanh %35 : vector<1x128xf32>
    %c6 = arith.constant 6 : index
    %37 = memref.load %arg1[%c6] : memref<57xf32, #tpu.memory_space<smem>>
    %38 = vector.broadcast %37 : f32 to vector<1x128xf32>
    %39 = arith.mulf %1, %38 : vector<1x128xf32>
    %c7 = arith.constant 7 : index
    %40 = memref.load %arg1[%c7] : memref<57xf32, #tpu.memory_space<smem>>
    %41 = vector.broadcast %40 : f32 to vector<1x128xf32>
    %42 = arith.mulf %3, %41 : vector<1x128xf32>
    %43 = arith.addf %39, %42 : vector<1x128xf32>
    %c13 = arith.constant 13 : index
    %44 = memref.load %arg1[%c13] : memref<57xf32, #tpu.memory_space<smem>>
    %45 = vector.broadcast %44 : f32 to vector<1x128xf32>
    %46 = arith.addf %43, %45 : vector<1x128xf32>
    %47 = math.tanh %46 : vector<1x128xf32>
    %c8 = arith.constant 8 : index
    %48 = memref.load %arg1[%c8] : memref<57xf32, #tpu.memory_space<smem>>
    %49 = vector.broadcast %48 : f32 to vector<1x128xf32>
    %50 = arith.mulf %1, %49 : vector<1x128xf32>
    %c9 = arith.constant 9 : index
    %51 = memref.load %arg1[%c9] : memref<57xf32, #tpu.memory_space<smem>>
    %52 = vector.broadcast %51 : f32 to vector<1x128xf32>
    %53 = arith.mulf %3, %52 : vector<1x128xf32>
    %54 = arith.addf %50, %53 : vector<1x128xf32>
    %c14 = arith.constant 14 : index
    %55 = memref.load %arg1[%c14] : memref<57xf32, #tpu.memory_space<smem>>
    %56 = vector.broadcast %55 : f32 to vector<1x128xf32>
    %57 = arith.addf %54, %56 : vector<1x128xf32>
    %58 = math.tanh %57 : vector<1x128xf32>
    %c15 = arith.constant 15 : index
    %59 = memref.load %arg1[%c15] : memref<57xf32, #tpu.memory_space<smem>>
    %60 = vector.broadcast %59 : f32 to vector<1x128xf32>
    %61 = arith.mulf %14, %60 : vector<1x128xf32>
    %c16 = arith.constant 16 : index
    %62 = memref.load %arg1[%c16] : memref<57xf32, #tpu.memory_space<smem>>
    %63 = vector.broadcast %62 : f32 to vector<1x128xf32>
    %64 = arith.mulf %25, %63 : vector<1x128xf32>
    %65 = arith.addf %61, %64 : vector<1x128xf32>
    %c17 = arith.constant 17 : index
    %66 = memref.load %arg1[%c17] : memref<57xf32, #tpu.memory_space<smem>>
    %67 = vector.broadcast %66 : f32 to vector<1x128xf32>
    %68 = arith.mulf %36, %67 : vector<1x128xf32>
    %69 = arith.addf %65, %68 : vector<1x128xf32>
    %c18 = arith.constant 18 : index
    %70 = memref.load %arg1[%c18] : memref<57xf32, #tpu.memory_space<smem>>
    %71 = vector.broadcast %70 : f32 to vector<1x128xf32>
    %72 = arith.mulf %47, %71 : vector<1x128xf32>
    %73 = arith.addf %69, %72 : vector<1x128xf32>
    %c19 = arith.constant 19 : index
    %74 = memref.load %arg1[%c19] : memref<57xf32, #tpu.memory_space<smem>>
    %75 = vector.broadcast %74 : f32 to vector<1x128xf32>
    %76 = arith.mulf %58, %75 : vector<1x128xf32>
    %77 = arith.addf %73, %76 : vector<1x128xf32>
    %c40 = arith.constant 40 : index
    %78 = memref.load %arg1[%c40] : memref<57xf32, #tpu.memory_space<smem>>
    %79 = vector.broadcast %78 : f32 to vector<1x128xf32>
    %80 = arith.addf %77, %79 : vector<1x128xf32>
    %81 = math.tanh %80 : vector<1x128xf32>
    %c20 = arith.constant 20 : index
    %82 = memref.load %arg1[%c20] : memref<57xf32, #tpu.memory_space<smem>>
    %83 = vector.broadcast %82 : f32 to vector<1x128xf32>
    %84 = arith.mulf %14, %83 : vector<1x128xf32>
    %c21 = arith.constant 21 : index
    %85 = memref.load %arg1[%c21] : memref<57xf32, #tpu.memory_space<smem>>
    %86 = vector.broadcast %85 : f32 to vector<1x128xf32>
    %87 = arith.mulf %25, %86 : vector<1x128xf32>
    %88 = arith.addf %84, %87 : vector<1x128xf32>
    %c22 = arith.constant 22 : index
    %89 = memref.load %arg1[%c22] : memref<57xf32, #tpu.memory_space<smem>>
    %90 = vector.broadcast %89 : f32 to vector<1x128xf32>
    %91 = arith.mulf %36, %90 : vector<1x128xf32>
    %92 = arith.addf %88, %91 : vector<1x128xf32>
    %c23 = arith.constant 23 : index
    %93 = memref.load %arg1[%c23] : memref<57xf32, #tpu.memory_space<smem>>
    %94 = vector.broadcast %93 : f32 to vector<1x128xf32>
    %95 = arith.mulf %47, %94 : vector<1x128xf32>
    %96 = arith.addf %92, %95 : vector<1x128xf32>
    %c24 = arith.constant 24 : index
    %97 = memref.load %arg1[%c24] : memref<57xf32, #tpu.memory_space<smem>>
    %98 = vector.broadcast %97 : f32 to vector<1x128xf32>
    %99 = arith.mulf %58, %98 : vector<1x128xf32>
    %100 = arith.addf %96, %99 : vector<1x128xf32>
    %c41 = arith.constant 41 : index
    %101 = memref.load %arg1[%c41] : memref<57xf32, #tpu.memory_space<smem>>
    %102 = vector.broadcast %101 : f32 to vector<1x128xf32>
    %103 = arith.addf %100, %102 : vector<1x128xf32>
    %104 = math.tanh %103 : vector<1x128xf32>
    %c25 = arith.constant 25 : index
    %105 = memref.load %arg1[%c25] : memref<57xf32, #tpu.memory_space<smem>>
    %106 = vector.broadcast %105 : f32 to vector<1x128xf32>
    %107 = arith.mulf %14, %106 : vector<1x128xf32>
    %c26 = arith.constant 26 : index
    %108 = memref.load %arg1[%c26] : memref<57xf32, #tpu.memory_space<smem>>
    %109 = vector.broadcast %108 : f32 to vector<1x128xf32>
    %110 = arith.mulf %25, %109 : vector<1x128xf32>
    %111 = arith.addf %107, %110 : vector<1x128xf32>
    %c27 = arith.constant 27 : index
    %112 = memref.load %arg1[%c27] : memref<57xf32, #tpu.memory_space<smem>>
    %113 = vector.broadcast %112 : f32 to vector<1x128xf32>
    %114 = arith.mulf %36, %113 : vector<1x128xf32>
    %115 = arith.addf %111, %114 : vector<1x128xf32>
    %c28 = arith.constant 28 : index
    %116 = memref.load %arg1[%c28] : memref<57xf32, #tpu.memory_space<smem>>
    %117 = vector.broadcast %116 : f32 to vector<1x128xf32>
    %118 = arith.mulf %47, %117 : vector<1x128xf32>
    %119 = arith.addf %115, %118 : vector<1x128xf32>
    %c29 = arith.constant 29 : index
    %120 = memref.load %arg1[%c29] : memref<57xf32, #tpu.memory_space<smem>>
    %121 = vector.broadcast %120 : f32 to vector<1x128xf32>
    %122 = arith.mulf %58, %121 : vector<1x128xf32>
    %123 = arith.addf %119, %122 : vector<1x128xf32>
    %c42 = arith.constant 42 : index
    %124 = memref.load %arg1[%c42] : memref<57xf32, #tpu.memory_space<smem>>
    %125 = vector.broadcast %124 : f32 to vector<1x128xf32>
    %126 = arith.addf %123, %125 : vector<1x128xf32>
    %127 = math.tanh %126 : vector<1x128xf32>
    %c30 = arith.constant 30 : index
    %128 = memref.load %arg1[%c30] : memref<57xf32, #tpu.memory_space<smem>>
    %129 = vector.broadcast %128 : f32 to vector<1x128xf32>
    %130 = arith.mulf %14, %129 : vector<1x128xf32>
    %c31 = arith.constant 31 : index
    %131 = memref.load %arg1[%c31] : memref<57xf32, #tpu.memory_space<smem>>
    %132 = vector.broadcast %131 : f32 to vector<1x128xf32>
    %133 = arith.mulf %25, %132 : vector<1x128xf32>
    %134 = arith.addf %130, %133 : vector<1x128xf32>
    %c32 = arith.constant 32 : index
    %135 = memref.load %arg1[%c32] : memref<57xf32, #tpu.memory_space<smem>>
    %136 = vector.broadcast %135 : f32 to vector<1x128xf32>
    %137 = arith.mulf %36, %136 : vector<1x128xf32>
    %138 = arith.addf %134, %137 : vector<1x128xf32>
    %c33 = arith.constant 33 : index
    %139 = memref.load %arg1[%c33] : memref<57xf32, #tpu.memory_space<smem>>
    %140 = vector.broadcast %139 : f32 to vector<1x128xf32>
    %141 = arith.mulf %47, %140 : vector<1x128xf32>
    %142 = arith.addf %138, %141 : vector<1x128xf32>
    %c34 = arith.constant 34 : index
    %143 = memref.load %arg1[%c34] : memref<57xf32, #tpu.memory_space<smem>>
    %144 = vector.broadcast %143 : f32 to vector<1x128xf32>
    %145 = arith.mulf %58, %144 : vector<1x128xf32>
    %146 = arith.addf %142, %145 : vector<1x128xf32>
    %c43 = arith.constant 43 : index
    %147 = memref.load %arg1[%c43] : memref<57xf32, #tpu.memory_space<smem>>
    %148 = vector.broadcast %147 : f32 to vector<1x128xf32>
    %149 = arith.addf %146, %148 : vector<1x128xf32>
    %150 = math.tanh %149 : vector<1x128xf32>
    %c35 = arith.constant 35 : index
    %151 = memref.load %arg1[%c35] : memref<57xf32, #tpu.memory_space<smem>>
    %152 = vector.broadcast %151 : f32 to vector<1x128xf32>
    %153 = arith.mulf %14, %152 : vector<1x128xf32>
    %c36 = arith.constant 36 : index
    %154 = memref.load %arg1[%c36] : memref<57xf32, #tpu.memory_space<smem>>
    %155 = vector.broadcast %154 : f32 to vector<1x128xf32>
    %156 = arith.mulf %25, %155 : vector<1x128xf32>
    %157 = arith.addf %153, %156 : vector<1x128xf32>
    %c37 = arith.constant 37 : index
    %158 = memref.load %arg1[%c37] : memref<57xf32, #tpu.memory_space<smem>>
    %159 = vector.broadcast %158 : f32 to vector<1x128xf32>
    %160 = arith.mulf %36, %159 : vector<1x128xf32>
    %161 = arith.addf %157, %160 : vector<1x128xf32>
    %c38 = arith.constant 38 : index
    %162 = memref.load %arg1[%c38] : memref<57xf32, #tpu.memory_space<smem>>
    %163 = vector.broadcast %162 : f32 to vector<1x128xf32>
    %164 = arith.mulf %47, %163 : vector<1x128xf32>
    %165 = arith.addf %161, %164 : vector<1x128xf32>
    %c39 = arith.constant 39 : index
    %166 = memref.load %arg1[%c39] : memref<57xf32, #tpu.memory_space<smem>>
    %167 = vector.broadcast %166 : f32 to vector<1x128xf32>
    %168 = arith.mulf %58, %167 : vector<1x128xf32>
    %169 = arith.addf %165, %168 : vector<1x128xf32>
    %c44 = arith.constant 44 : index
    %170 = memref.load %arg1[%c44] : memref<57xf32, #tpu.memory_space<smem>>
    %171 = vector.broadcast %170 : f32 to vector<1x128xf32>
    %172 = arith.addf %169, %171 : vector<1x128xf32>
    %173 = math.tanh %172 : vector<1x128xf32>
    %c45 = arith.constant 45 : index
    %174 = memref.load %arg1[%c45] : memref<57xf32, #tpu.memory_space<smem>>
    %175 = vector.broadcast %174 : f32 to vector<1x128xf32>
    %176 = arith.mulf %81, %175 : vector<1x128xf32>
    %c46 = arith.constant 46 : index
    %177 = memref.load %arg1[%c46] : memref<57xf32, #tpu.memory_space<smem>>
    %178 = vector.broadcast %177 : f32 to vector<1x128xf32>
    %179 = arith.mulf %104, %178 : vector<1x128xf32>
    %180 = arith.addf %176, %179 : vector<1x128xf32>
    %c47 = arith.constant 47 : index
    %181 = memref.load %arg1[%c47] : memref<57xf32, #tpu.memory_space<smem>>
    %182 = vector.broadcast %181 : f32 to vector<1x128xf32>
    %183 = arith.mulf %127, %182 : vector<1x128xf32>
    %184 = arith.addf %180, %183 : vector<1x128xf32>
    %c48 = arith.constant 48 : index
    %185 = memref.load %arg1[%c48] : memref<57xf32, #tpu.memory_space<smem>>
    %186 = vector.broadcast %185 : f32 to vector<1x128xf32>
    %187 = arith.mulf %150, %186 : vector<1x128xf32>
    %188 = arith.addf %184, %187 : vector<1x128xf32>
    %c49 = arith.constant 49 : index
    %189 = memref.load %arg1[%c49] : memref<57xf32, #tpu.memory_space<smem>>
    %190 = vector.broadcast %189 : f32 to vector<1x128xf32>
    %191 = arith.mulf %173, %190 : vector<1x128xf32>
    %192 = arith.addf %188, %191 : vector<1x128xf32>
    %c55 = arith.constant 55 : index
    %193 = memref.load %arg1[%c55] : memref<57xf32, #tpu.memory_space<smem>>
    %194 = vector.broadcast %193 : f32 to vector<1x128xf32>
    %195 = arith.addf %192, %194 : vector<1x128xf32>
    %196 = math.tanh %195 : vector<1x128xf32>
    %c50 = arith.constant 50 : index
    %197 = memref.load %arg1[%c50] : memref<57xf32, #tpu.memory_space<smem>>
    %198 = vector.broadcast %197 : f32 to vector<1x128xf32>
    %199 = arith.mulf %81, %198 : vector<1x128xf32>
    %c51 = arith.constant 51 : index
    %200 = memref.load %arg1[%c51] : memref<57xf32, #tpu.memory_space<smem>>
    %201 = vector.broadcast %200 : f32 to vector<1x128xf32>
    %202 = arith.mulf %104, %201 : vector<1x128xf32>
    %203 = arith.addf %199, %202 : vector<1x128xf32>
    %c52 = arith.constant 52 : index
    %204 = memref.load %arg1[%c52] : memref<57xf32, #tpu.memory_space<smem>>
    %205 = vector.broadcast %204 : f32 to vector<1x128xf32>
    %206 = arith.mulf %127, %205 : vector<1x128xf32>
    %207 = arith.addf %203, %206 : vector<1x128xf32>
    %c53 = arith.constant 53 : index
    %208 = memref.load %arg1[%c53] : memref<57xf32, #tpu.memory_space<smem>>
    %209 = vector.broadcast %208 : f32 to vector<1x128xf32>
    %210 = arith.mulf %150, %209 : vector<1x128xf32>
    %211 = arith.addf %207, %210 : vector<1x128xf32>
    %c54 = arith.constant 54 : index
    %212 = memref.load %arg1[%c54] : memref<57xf32, #tpu.memory_space<smem>>
    %213 = vector.broadcast %212 : f32 to vector<1x128xf32>
    %214 = arith.mulf %173, %213 : vector<1x128xf32>
    %215 = arith.addf %211, %214 : vector<1x128xf32>
    %c56 = arith.constant 56 : index
    %216 = memref.load %arg1[%c56] : memref<57xf32, #tpu.memory_space<smem>>
    %217 = vector.broadcast %216 : f32 to vector<1x128xf32>
    %218 = arith.addf %215, %217 : vector<1x128xf32>
    %219 = math.tanh %218 : vector<1x128xf32>
    %c0_6 = arith.constant 0 : index
    %c0_7 = arith.constant 0 : index
    %c0_8 = arith.constant 0 : index
    %220 = vector.load %arg3[%c0_6, %c0_7, %c0_8] : memref<2x1x128xf32, #tpu.memory_space<vmem>>, vector<1x1x128xf32>
    %221 = vector.shape_cast %220 : vector<1x1x128xf32> to vector<1x128xf32>
    %222 = vector.shape_cast %196 : vector<1x128xf32> to vector<1x1x128xf32>
    tpu.vector_store %arg3[%c0_6, %c0_7, %c0_8], %222 {strides = array<i32>} : memref<2x1x128xf32, #tpu.memory_space<vmem>>, vector<1x1x128xf32>,
    %c1_9 = arith.constant 1 : index
    %c0_10 = arith.constant 0 : index
    %c0_11 = arith.constant 0 : index
    %223 = vector.load %arg3[%c1_9, %c0_10, %c0_11] : memref<2x1x128xf32, #tpu.memory_space<vmem>>, vector<1x1x128xf32>
    %224 = vector.shape_cast %223 : vector<1x1x128xf32> to vector<1x128xf32>
    %225 = vector.shape_cast %219 : vector<1x128xf32> to vector<1x1x128xf32>
    tpu.vector_store %arg3[%c1_9, %c0_10, %c0_11], %225 {strides = array<i32>} : memref<2x1x128xf32, #tpu.memory_space<vmem>>, vector<1x1x128xf32>,
    return
  }
  func.func @transform_0(%arg0: i32) -> i32 {
    %c0_i32 = arith.constant 0 : i32
    %c0_i32_0 = arith.constant 0 : i32
    return %c0_i32 : i32
  }
  func.func @transform_1(%arg0: i32) -> (i32, i32, i32) {
    %c0_i32 = arith.constant 0 : i32
    %c0_i32_0 = arith.constant 0 : i32
    %c0_i32_1 = arith.constant 0 : i32
    return %c0_i32, %arg0, %c0_i32_0 : i32, i32, i32
  }
  func.func @transform_2(%arg0: i32) -> (i32, i32, i32) {
    %c0_i32 = arith.constant 0 : i32
    %c0_i32_0 = arith.constant 0 : i32
    %c0_i32_1 = arith.constant 0 : i32
    return %c0_i32, %arg0, %c0_i32_0 : i32, i32, i32
  }
}

</mosaic_0001>

<bundles_post_ra>
// kernel: network_forward.1
= control target key start
LH: loop header
LB: loop body
LE: loop exit
PB: predicated region body
PF: predicated region fallthrough
CT: control target
= control target key end

     0   :  { %7 = vsyncpa [#allocation3], 0  ;;  %s509_s0 = inlined_call_operand.vmem [shape: f32[57], index: 0, kind: input, shape index: {}]   ;;  %s510_s1 = inlined_call_operand.vmem [shape: f32[2,1,128], index: 1, kind: input, shape index: {}]   ;;  %s511_s2 = inlined_call_operand.vmem [shape: f32[2,1,128], index: 2, kind: output, shape index: {}]  }
   0x1   :  { %s14_s11 = sshll.u32 %s509_s0, 4  ;;  %s15_s11 = int_to_ptr.vmem [resolvable:$true] %s14_s11 }
   0x2   :  { %s334_s12 = scalar_lea.vmem %s15_s11, 16  ;;  %p339_p1 = scmp.lt.s32.totalorder %s15_s11, %s15_s11 }
   0x3   :  { %p335_p0 = scmp.ne.s32.totalorder %s15_s11, %s334_s12  ;;  %p340_p2 = scmp.lt.s32.totalorder %s334_s12, %s334_s12 }
   0x5   :  { %p341_p3 = por %p340_p2, %p339_p1 }
   0x7   :  { %p342_p4 = pnand %p341_p3, %p335_p0 }
   0x9   :  { %345 = shalt.err (!%p342_p4)
}
   0xa   :  { %s348_s13 = smov [#allocation2]  }
   0xb   :  { %17 = dma.vmem_to_smem %s15_s11, 16, %s348_s13, [#allocation3]  }
   0xc   :  { %346 = dma.done.wait [#allocation3], 16  }
   0xd   :  { %347 = vsyncadd [#allocation3], 4294967280 }
   0xe   :  { %23 = sfence }
   0xf   :  { %s27_s14 = sld [smem:[#allocation2]]  ;;  %s252_s15 = sld [smem:[#allocation2 + $0x1]]  ;;  %v24_v0 = vld [vmem:[%s510_s1] sm:$0x1]  ;;  %v251_v1 = vld [vmem:[%s510_s1 + $0x1] sm:$0x1] }
  0x10   :  { %s367_s16 = sld [smem:[#allocation2 + $0xa]]  ;;  %s255_s18 = sld [smem:[#allocation2 + $0x3]] }
  0x11   :  { %s254_s17 = sld [smem:[#allocation2 + $0x2]]  ;;  %s369_s0 = sld [smem:[#allocation2 + $0xb]] }
  0x12   :  { %s257_s19 = sld [smem:[#allocation2 + $0x4]]  ;;  %s374_s22 = sld [smem:[#allocation2 + $0x5]] }
  0x13   :  { %s376_s23 = sld [smem:[#allocation2 + $0xc]]  ;;  %s381_s26 = sld [smem:[#allocation2 + $0x6]] }
  0x14   :  { %s383_s27 = sld [smem:[#allocation2 + $0x7]]  ;;  %s385_s28 = sld [smem:[#allocation2 + $0xd]] }
  0x15   :  { %v28_v2 = vstv %s27_s14  ;;  %s387_s29 = sld [smem:[#allocation2 + $0x8]]  ;;  %v31_v4 = vstv %s252_s15  ;;  %s389_s30 = sld [smem:[#allocation2 + $0x9]] }
  0x16   :  { %v29_v3 = vmul.f32 %v28_v2, %v24_v0  ;;  %s391_s3 = sld [smem:[#allocation2 + $0xe]]  ;;  %v32_v5 = vmul.f32 %v251_v1, %v31_v4  ;;  %v35_v6 = vstv %s367_s16  ;;  %v42_v8 = vstv %s255_s18  ;;  %s394_s1 = sld [smem:[#allocation2 + $0xf]] }
  0x17   :  { %v39_v7 = vstv %s254_s17  ;;  %s396_s4 = sld [smem:[#allocation2 + $0x10]]  ;;  %v43_v10 = vmul.f32 %v251_v1, %v42_v8  ;;  %v46_v11 = vstv %s369_s0  ;;  %s399_s5 = sld [smem:[#allocation2 + $0x11]] }
  0x18   :  { %v40_v9 = vmul.f32 %v39_v7, %v24_v0  ;;  %v50_v12 = vstv %s257_s19  ;;  %s401_s6 = sld [smem:[#allocation2 + $0x12]]  ;;  %v33_v13 = vadd.f32 %v32_v5, %v29_v3  ;;  %v53_v15 = vstv %s374_s22  ;;  %s405_s7 = sld [smem:[#allocation2 + $0x13]] }
  0x19   :  { %v51_v14 = vmul.f32 %v50_v12, %v24_v0  ;;  %v57_v16 = vstv %s376_s23  ;;  %s407_s8 = sld [smem:[#allocation2 + $0x28]]  ;;  %v54_v18 = vmul.f32 %v251_v1, %v53_v15  ;;  %v61_v19 = vstv %s381_s26  ;;  %s411_s9 = sld [smem:[#allocation2 + $0x14]] }
  0x1a   :  { %v44_v17 = vadd.f32 %v43_v10, %v40_v9  ;;  %v64_v20 = vstv %s383_s27  ;;  %s413_s10 = sld [smem:[#allocation2 + $0x15]]  ;;  %v36_v21 = vadd.f32 %v35_v6, %v33_v13  ;;  %v62_v22 = vmul.f32 %v61_v19, %v24_v0  ;;  %s416_s11 = sld [smem:[#allocation2 + $0x16]] }
  0x1b   :  { %v65_v23 = vmul.f32 %v251_v1, %v64_v20  ;;  %v68_v24 = vstv %s385_s28  ;;  %s418_s12 = sld [smem:[#allocation2 + $0x17]]  ;;  %v55_v26 = vadd.f32 %v54_v18, %v51_v14  ;;  %v72_v27 = vstv %s387_s29  ;;  %s422_s13 = sld [smem:[#allocation2 + $0x18]] }
  0x1c   :  { %v47_v25 = vadd.f32 %v46_v11, %v44_v17  ;;  %v75_v28 = vstv %s389_s30  ;;  %s424_s14 = sld [smem:[#allocation2 + $0x29]]  ;;  %310 = vtanh.f32 %v36_v21  ;;  %v73_v30 = vmul.f32 %v72_v27, %v24_v0  ;;  %s428_s16 = sld [smem:[#allocation2 + $0x1a]] }
  0x1d   :  { %v66_v29 = vadd.f32 %v65_v23, %v62_v22  ;;  %v76_v31 = vmul.f32 %v251_v1, %v75_v28  ;;  %s426_s15 = sld [smem:[#allocation2 + $0x19]]  ;;  %v58_v32 = vadd.f32 %v57_v16, %v55_v26  ;;  %v79_v33 = vstv %s391_s3  ;;  %s431_s17 = sld [smem:[#allocation2 + $0x1b]] }
  0x1e   :  { %312 = vtanh.f32 %v47_v25  ;;  %s433_s18 = sld [smem:[#allocation2 + $0x1c]]  ;;  %s435_s0 = sld [smem:[#allocation2 + $0x1d]]  ;;  %v83_v37 = vstv %s394_s1  ;;  %v86_v38 = vstv %s396_s4  ;;  %v90_v39 = vstv %s399_s5 }
  0x1f   :  { %v69_v34 = vadd.f32 %v68_v24, %v66_v29  ;;  %v77_v35 = vadd.f32 %v76_v31, %v73_v30  ;;  %s437_s19 = sld [smem:[#allocation2 + $0x2a]]  ;;  %314 = vtanh.f32 %v58_v32  ;;  %s439_s20 = sld [smem:[#allocation2 + $0x1e]]  ;;  %v94_v40 = vstv %s401_s6 }
  0x20   :  { %s441_s21 = sld [smem:[#allocation2 + $0x1f]]  ;;  %s443_s22 = sld [smem:[#allocation2 + $0x20]]  ;;  %v98_v41 = vstv %s405_s7  ;;  %v102_v42 = vstv %s407_s8  ;;  %v106_v43 = vstv %s411_s9  ;;  %v109_v44 = vstv %s413_s10 }
  0x21   :  { %316 = vtanh.f32 %v69_v34  ;;  %v80_v36 = vadd.f32 %v79_v33, %v77_v35  ;;  %s447_s23 = sld [smem:[#allocation2 + $0x21]]  ;;  %s449_s24 = sld [smem:[#allocation2 + $0x22]]  ;;  %v113_v45 = vstv %s416_s11  ;;  %v117_v46 = vstv %s418_s12 }
  0x22   :  { %s454_s25 = sld [smem:[#allocation2 + $0x23]]  ;;  %s456_s26 = sld [smem:[#allocation2 + $0x24]]  ;;  %v121_v47 = vstv %s422_s13  ;;  %v125_v48 = vstv %s424_s14  ;;  %v132_v50 = vstv %s428_s16 }
  0x23   :  { %318 = vtanh.f32 %v80_v36  ;;  %v129_v49 = vstv %s426_s15  ;;  %v136_v51 = vstv %s431_s17  ;;  %s474_s27 = sld [smem:[#allocation2 + $0x25]]  ;;  %s480_s28 = sld [smem:[#allocation2 + $0x26]] }
  0x24   :  { %v140_v55 = vstv %s433_s18  ;;  %v144_v56 = vstv %s435_s0  ;;  %s482_s29 = sld [smem:[#allocation2 + $0x2b]]  ;;  %s484_s30 = sld [smem:[#allocation2 + $0x27]] }
  0x25   :  { %v152_v52 = vstv %s439_s20  ;;  %v148_v57 = vstv %s437_s19  ;;  %s486_s3 = sld [smem:[#allocation2 + $0x2c]]  ;;  %s296_s1 = sld [smem:[#allocation2 + $0x2d]] }
  0x26   :  { %v155_v53 = vstv %s441_s21  ;;  %v311_v54 = vpop.eup %310  ;;  %v159_v58 = vstv %s443_s22  ;;  %s302_s4 = sld [smem:[#allocation2 + $0x32]]  ;;  %s297_s5 = sld [smem:[#allocation2 + $0x2e]] }
  0x27   :  { %v84_v60 = vmul.f32 %v311_v54, %v83_v37  ;;  %v107_v61 = vmul.f32 %v311_v54, %v106_v43  ;;  %v130_v62 = vmul.f32 %v311_v54, %v129_v49  ;;  %v153_v63 = vmul.f32 %v311_v54, %v152_v52  ;;  %s303_s6 = sld [smem:[#allocation2 + $0x33]]  ;;  %s298_s7 = sld [smem:[#allocation2 + $0x2f]] }
  0x28   :  { %v313_v59 = vpop.eup %312  ;;  %v163_v5 = vstv %s447_s23  ;;  %v167_v6 = vstv %s449_s24  ;;  %v175_v7 = vstv %s454_s25  ;;  %v178_v8 = vstv %s456_s26  ;;  %s304_s8 = sld [smem:[#allocation2 + $0x34]]  ;;  %s299_s9 = sld [smem:[#allocation2 + $0x30]] }
  0x29   :  { %v87_v0 = vmul.f32 %v313_v59, %v86_v38  ;;  %v110_v1 = vmul.f32 %v313_v59, %v109_v44  ;;  %v133_v2 = vmul.f32 %v313_v59, %v132_v50  ;;  %v156_v3 = vmul.f32 %v313_v59, %v155_v53  ;;  %v315_v4 = vpop.eup %314  ;;  %s305_s10 = sld [smem:[#allocation2 + $0x35]]  ;;  %s497_s11 = sld [smem:[#allocation2 + $0x31]] }
  0x2a   :  { %v91_v11 = vmul.f32 %v315_v4, %v90_v39  ;;  %v114_v13 = vmul.f32 %v315_v4, %v113_v45  ;;  %v137_v17 = vmul.f32 %v315_v4, %v136_v51  ;;  %v160_v29 = vmul.f32 %v315_v4, %v159_v58  ;;  %s499_s12 = sld [smem:[#allocation2 + $0x36]]  ;;  %s301_s13 = sld [smem:[#allocation2 + $0x37]] }
  0x2b   :  { %v317_v9 = vpop.eup %316  ;;  %v88_v10 = vadd.f32 %v87_v0, %v84_v60  ;;  %v111_v12 = vadd.f32 %v110_v1, %v107_v61  ;;  %v134_v16 = vadd.f32 %v133_v2, %v130_v62  ;;  %v157_v22 = vadd.f32 %v156_v3, %v153_v63  ;;  %s307_s14 = sld [smem:[#allocation2 + $0x38]] }
  0x2c   :  { %v95_v14 = vmul.f32 %v317_v9, %v94_v40  ;;  %v118_v15 = vmul.f32 %v317_v9, %v117_v46  ;;  %v141_v21 = vmul.f32 %v317_v9, %v140_v55  ;;  %v164_v30 = vmul.f32 %v317_v9, %v163_v5 }
  0x2d   :  { %v319_v18 = vpop.eup %318  ;;  %v92_v19 = vadd.f32 %v91_v11, %v88_v10  ;;  %v115_v20 = vadd.f32 %v114_v13, %v111_v12  ;;  %v138_v25 = vadd.f32 %v137_v17, %v134_v16  ;;  %v176_v33 = vmul.f32 %v311_v54, %v175_v7 }
  0x2e   :  { %v99_v23 = vmul.f32 %v319_v18, %v98_v41  ;;  %v122_v24 = vmul.f32 %v319_v18, %v121_v47  ;;  %v145_v26 = vmul.f32 %v319_v18, %v144_v56  ;;  %v168_v32 = vmul.f32 %v319_v18, %v167_v6 }
  0x2f   :  { %v96_v27 = vadd.f32 %v95_v14, %v92_v19  ;;  %v119_v28 = vadd.f32 %v118_v15, %v115_v20  ;;  %v142_v31 = vadd.f32 %v141_v21, %v138_v25  ;;  %v179_v34 = vmul.f32 %v313_v59, %v178_v8 }
  0x30   :  { %v161_v37 = vadd.f32 %v160_v29, %v157_v22  ;;  %v182_v38 = vstv %s474_s27  ;;  %v186_v43 = vstv %s480_s28  ;;  %v171_v50 = vstv %s482_s29 }
  0x31   :  { %v100_v35 = vadd.f32 %v99_v23, %v96_v27  ;;  %v123_v36 = vadd.f32 %v122_v24, %v119_v28  ;;  %v146_v39 = vadd.f32 %v145_v26, %v142_v31  ;;  %v180_v40 = vadd.f32 %v179_v34, %v176_v33 }
  0x32   :  { %v183_v41 = vmul.f32 %v315_v4, %v182_v38  ;;  %v165_v46 = vadd.f32 %v164_v30, %v161_v37  ;;  %v187_v47 = vmul.f32 %v317_v9, %v186_v43  ;;  %v190_v52 = vstv %s484_s30 }
  0x33   :  { %v103_v44 = vadd.f32 %v102_v42, %v100_v35  ;;  %v126_v45 = vadd.f32 %v125_v48, %v123_v36  ;;  %v149_v49 = vadd.f32 %v148_v57, %v146_v39  ;;  %v191_v54 = vmul.f32 %v319_v18, %v190_v52 }
  0x34   :  { %v184_v51 = vadd.f32 %v183_v41, %v180_v40  ;;  %v169_v53 = vadd.f32 %v168_v32, %v165_v46  ;;  %v194_v56 = vstv %s486_s3  ;;  %v198_v58 = vstv %s296_s1 }
  0x35   :  { %320 = vtanh.f32 %v103_v44  ;;  %v221_v59 = vstv %s302_s4  ;;  %v201_v60 = vstv %s297_s5  ;;  %v224_v61 = vstv %s303_s6 }
  0x36   :  { %322 = vtanh.f32 %v126_v45  ;;  %v188_v55 = vadd.f32 %v187_v47, %v184_v51  ;;  %v172_v42 = vadd.f32 %v171_v50, %v169_v53  ;;  %v205_v63 = vstv %s298_s7 }
  0x37   :  { %324 = vtanh.f32 %v149_v49  ;;  %v228_v0 = vstv %s304_s8  ;;  %v209_v6 = vstv %s299_s9  ;;  %v232_v8 = vstv %s305_s10 }
  0x38   :  { %v192_v48 = vadd.f32 %v191_v54, %v188_v55  ;;  %326 = vtanh.f32 %v172_v42  ;;  %v213_v15 = vstv %s497_s11  ;;  %v236_v17 = vstv %s499_s12 }
  0x39   :  { %v217_v25 = vstv %s301_s13  ;;  %v240_v26 = vstv %s307_s14 }
  0x3a   :  { %v195_v57 = vadd.f32 %v194_v56, %v192_v48 }
  0x3c   :  { %328 = vtanh.f32 %v195_v57 }
  0x3f   :  { %v321_v62 = vpop.eup %320 }
  0x40   :  { %v323_v1 = vpop.eup %322  ;;  %v199_v2 = vmul.f32 %v321_v62, %v198_v58  ;;  %v222_v3 = vmul.f32 %v321_v62, %v221_v59 }
  0x41   :  { %v325_v4 = vpop.eup %324  ;;  %v202_v5 = vmul.f32 %v323_v1, %v201_v60  ;;  %v225_v7 = vmul.f32 %v323_v1, %v224_v61 }
  0x42   :  { %v206_v9 = vmul.f32 %v325_v4, %v205_v63  ;;  %v229_v10 = vmul.f32 %v325_v4, %v228_v0  ;;  %v327_v11 = vpop.eup %326 }
  0x43   :  { %v203_v12 = vadd.f32 %v202_v5, %v199_v2  ;;  %v226_v13 = vadd.f32 %v225_v7, %v222_v3  ;;  %v210_v14 = vmul.f32 %v327_v11, %v209_v6  ;;  %v233_v16 = vmul.f32 %v327_v11, %v232_v8 }
  0x45   :  { %v207_v18 = vadd.f32 %v206_v9, %v203_v12  ;;  %v230_v19 = vadd.f32 %v229_v10, %v226_v13 }
  0x46   :  { %v329_v20 = vpop.eup %328 }
  0x47   :  { %v211_v21 = vadd.f32 %v210_v14, %v207_v18  ;;  %v214_v22 = vmul.f32 %v329_v20, %v213_v15  ;;  %v234_v23 = vadd.f32 %v233_v16, %v230_v19  ;;  %v237_v24 = vmul.f32 %v329_v20, %v236_v17 }
  0x49   :  { %v215_v27 = vadd.f32 %v214_v22, %v211_v21  ;;  %v238_v28 = vadd.f32 %v237_v24, %v234_v23 }
  0x4b   :  { %v218_v29 = vadd.f32 %v217_v25, %v215_v27  ;;  %v241_v30 = vadd.f32 %v240_v26, %v238_v28 }
  0x4d   :  { %330 = vtanh.f32 %v218_v29 }
  0x4e   :  { %332 = vtanh.f32 %v241_v30 }
  0x57   :  { %v331_v31 = vpop.eup %330 }
  0x58   :  { %v333_v32 = vpop.eup %332  ;;  %243 = vst [vmem:[%s511_s2] sm:$0x1] %v331_v31 }
  0x59   :  { %308 = vst [vmem:[%s511_s2 + $0x1] sm:$0x1] %v333_v32 }
  0x5a   :  { %250 = vsyncpa [#allocation3], 1 }

</bundles_post_ra>
